<compile_context>
chip_gen: v7x
topology: tpu7x:2x2x1
jax: 0.10.0
libtpu: 0.0.40
codegen_flags: <defaults>
</compile_context>

<pallas_src>
import functools

import jax
import jax.numpy as jnp
from jax.experimental import pallas as pl
from jax.experimental.pallas import tpu as pltpu

_COLS = 1024            # lane-dense last dim (multiple of 128) -> unmasked vst
_MAX_TILE_ROWS = 1024   # 1024 * 1024 * 4 B = 4 MiB per tile buffer


def _posterize_kernel(x_ref, o_ref, *, bits: int):
    # x_ref / o_ref: (tile_r, _COLS) float32 tiles in VMEM.
    x = x_ref[...]
    # (x * 255).round().clip(0, 255) -- integer-valued f32 in [0, 255].
    v = jnp.clip(jnp.round(x * 255.0), 0.0, 255.0)
    shift = 8 - bits
    if shift > 0:
        # Keep only the top `bits` bits, entirely in f32:
        # floor(v * 2^-shift) * 2^shift == (int(v) >> shift) << shift exactly,
        # since v <= 255 and 2^shift is a power of two.
        q = float(1 << shift)
        v = jnp.floor(v * (1.0 / q)) * q
    # byte_tensor / 255 -> float32 (true divide for parity with reference).
    o_ref[...] = v / 255.0


def _posterize_rows(x2d: jax.Array, bits: int) -> jax.Array:
    """Run the streaming kernel over a (rows, 1024) f32 slab."""
    rows = x2d.shape[0]
    # Full-dim block if small; otherwise an 8-aligned tile with a ragged
    # (masked) last block -- no row padding needed.
    tile_r = rows if rows <= _MAX_TILE_ROWS else _MAX_TILE_ROWS
    grid = (pl.cdiv(rows, tile_r),)
    n = rows * _COLS
    return pl.pallas_call(
        functools.partial(_posterize_kernel, bits=bits),
        out_shape=jax.ShapeDtypeStruct((rows, _COLS), jnp.float32),
        grid=grid,
        in_specs=[pl.BlockSpec((tile_r, _COLS), lambda i: (i, 0))],
        out_specs=pl.BlockSpec((tile_r, _COLS), lambda i: (i, 0)),
        compiler_params=pltpu.CompilerParams(
            dimension_semantics=("parallel",),     # independent elementwise tiles
            vmem_limit_bytes=32 * 1024 * 1024,     # safe for 4 MiB tiles on v5e too
        ),
        cost_estimate=pl.CostEstimate(
            flops=7 * n, transcendentals=0, bytes_accessed=8 * n),
    )(x2d)


def _posterize_jnp(x: jax.Array, bits: int) -> jax.Array:
    """Plain-jnp fallback for the (<1024-element) misaligned tail."""
    v = jnp.clip(jnp.round(x * 255.0), 0.0, 255.0)
    shift = 8 - bits
    if shift > 0:
        q = float(1 << shift)
        v = jnp.floor(v * (1.0 / q)) * q
    return v / 255.0


def posterize_transform(x: jax.Array, bits: int = 8) -> jax.Array:
    """Pallas implementation of PosterizeModel._transform (any shape, f32)."""
    orig_shape = x.shape
    total = x.size
    flat = x.reshape(-1).astype(jnp.float32)       # zero-copy for f32 input

    n_aligned = (total // _COLS) * _COLS
    if n_aligned == total:
        # Fast path: zero-copy reshape, no pad, no trailing slice.
        out_flat = _posterize_rows(flat.reshape(-1, _COLS), bits).reshape(-1)
    else:
        parts = []
        if n_aligned > 0:
            head = _posterize_rows(
                flat[:n_aligned].reshape(-1, _COLS), bits).reshape(-1)
            parts.append(head)
        parts.append(_posterize_jnp(flat[n_aligned:], bits))
        out_flat = jnp.concatenate(parts)

    return out_flat.reshape(orig_shape)


def posterize_model_forward(x: jax.Array, bits: int = 8) -> jax.Array:
    """forward(x) = model(_transform(x)); `model` is identity here."""
    return posterize_transform(x, bits=bits)  # identity model


def _reference(x: jnp.ndarray, bits: int) -> jnp.ndarray:
    v = jnp.clip(jnp.round(x * 255.0), 0.0, 255.0).astype(jnp.int32)
    shift = 8 - bits
    if shift > 0:
        v = (v >> shift) << shift
    return v.astype(jnp.float32) / 255.0


if __name__ == "__main__":
    key = jax.random.PRNGKey(0)

    # Small NCHW input consistent with an image-transform module.
    # 2*4*16*16 = 2048 elements -> exercises the aligned zero-copy path.
    x = jax.random.uniform(key, (2, 4, 16, 16), dtype=jnp.float32)

    out = jax.block_until_ready(posterize_model_forward(x, bits=8))
    ref = _reference(x, 8)
    assert out.shape == x.shape and out.dtype == jnp.float32
    assert jnp.allclose(out, ref, atol=1e-6), "mismatch vs reference (bits=8)"

    out4 = jax.block_until_ready(posterize_model_forward(x, bits=4))
    ref4 = _reference(x, 4)
    assert jnp.allclose(out4, ref4, atol=1e-6), "mismatch vs reference (bits=4)"

    # Misaligned shape (2*3*17*19 = 1938 elements) -> prefix-kernel + jnp tail.
    key2 = jax.random.PRNGKey(0)
    y = jax.random.uniform(key2, (2, 3, 17, 19), dtype=jnp.float32)
    outy = jax.block_until_ready(posterize_model_forward(y, bits=3))
    refy = _reference(y, 3)
    assert outy.shape == y.shape
    assert jnp.allclose(outy, refy, atol=1e-6), "mismatch vs reference (bits=3, ragged)"

    print("KERNEL_OK")
</pallas_src>

<mosaic_0001>
module attributes {stable_mosaic.version = 11 : i64} {
  func.func @_posterize_kernel(%arg0: i32, %arg1: memref<2x1024xf32, #tpu.memory_space<vmem>>, %arg2: memref<2x1024xf32, #tpu.memory_space<vmem>>) attributes {dimension_semantics = [#tpu.dimension_semantics<parallel>], iteration_bounds = array<i64: 1>, scalar_prefetch = 0 : i64, scratch_operands = 0 : i64, tpu.core_type = #tpu.core_type<tc>, window_params = [{transform_indices = @transform_0, window_bounds = array<i64: 2, 1024>}, {transform_indices = @transform_1, window_bounds = array<i64: 2, 1024>}]} {
    %c0 = arith.constant 0 : index
    %c0_0 = arith.constant 0 : index
    %0 = vector.load %arg1[%c0, %c0_0] : memref<2x1024xf32, #tpu.memory_space<vmem>>, vector<2x1024xf32>
    %cst = arith.constant 2.550000e+02 : f32
    %1 = vector.broadcast %cst : f32 to vector<2x1024xf32>
    %2 = arith.mulf %0, %1 : vector<2x1024xf32>
    %3 = math.roundeven %2 : vector<2x1024xf32>
    %cst_1 = arith.constant 0.000000e+00 : f32
    %cst_2 = arith.constant 2.550000e+02 : f32
    %4 = vector.broadcast %cst_1 : f32 to vector<2x1024xf32>
    %5 = arith.maximumf %4, %3 : vector<2x1024xf32>
    %6 = vector.broadcast %cst_2 : f32 to vector<2x1024xf32>
    %7 = arith.minimumf %6, %5 : vector<2x1024xf32>
    %cst_3 = arith.constant 2.550000e+02 : f32
    %8 = vector.broadcast %cst_3 : f32 to vector<2x1024xf32>
    %9 = arith.divf %7, %8 : vector<2x1024xf32>
    %c0_4 = arith.constant 0 : index
    %c0_5 = arith.constant 0 : index
    %10 = vector.load %arg2[%c0_4, %c0_5] : memref<2x1024xf32, #tpu.memory_space<vmem>>, vector<2x1024xf32>
    tpu.vector_store %arg2[%c0_4, %c0_5], %9 {strides = array<i32>} : memref<2x1024xf32, #tpu.memory_space<vmem>>, vector<2x1024xf32>,
    return
  }
  func.func @transform_0(%arg0: i32) -> (i32, i32) {
    %c0_i32 = arith.constant 0 : i32
    %c0_i32_0 = arith.constant 0 : i32
    return %arg0, %c0_i32 : i32, i32
  }
  func.func @transform_1(%arg0: i32) -> (i32, i32) {
    %c0_i32 = arith.constant 0 : i32
    %c0_i32_0 = arith.constant 0 : i32
    return %arg0, %c0_i32 : i32, i32
  }
}

</mosaic_0001>

<bundles_post_ra>
// kernel: tpu_custom_call.1
= control target key start
LH: loop header
LB: loop body
LE: loop exit
PB: predicated region body
PF: predicated region fallthrough
CT: control target
= control target key end

     0   :  { %6 = vsyncpa [#allocation3], 0  ;;  %s139_s0 = inlined_call_operand.hbm [shape: f32[2,1024], index: 0, kind: input, shape index: {}]   ;;  %s140_s1 = inlined_call_operand.hbm [shape: f32[2,1024], index: 1, kind: output, shape index: {}]  }
   0x1   :  { %7 = vsyncpa [#allocation4], 0  ;;  %s103_s6 = smov [#allocation2]   ;;  %s55_s10 = scalar_lea.hbm %s139_s0, 256 }
   0x2   :  { %s14_s7 = sshll.u32 %s103_s6, 4  ;;  %p56_p0 = scmp.ne.s32.totalorder %s139_s0, %s55_s10  ;;  %s15_s7 = int_to_ptr.vmem [resolvable:$true] %s14_s7 }
   0x3   :  { %p59_p1 = scmp.lt.u32.totalorder %s55_s10, %s139_s0 }
   0x5   :  { %p61_p2 = pnand %p59_p1, %p56_p0 }
   0x7   :  { %64 = shalt.err (!%p61_p2)
}
   0x8   :  { %s65_s15 = scalar_lea.vmem %s15_s7, 256  ;;  %p70_p4 = scmp.lt.s32.totalorder %s15_s7, %s15_s7 }
   0x9   :  { %p66_p3 = scmp.ne.s32.totalorder %s15_s7, %s65_s15  ;;  %p71_p5 = scmp.lt.s32.totalorder %s65_s15, %s65_s15 }
   0xb   :  { %p72_p6 = por %p71_p5, %p70_p4 }
   0xd   :  { %p73_p7 = pnand %p72_p6, %p66_p3 }
   0xf   :  { %76 = shalt.err (!%p73_p7)
}
  0x10   :  { %17 = dma.hbm_to_vmem [thread:$0]  %s139_s0, 256, %s15_s7, [#allocation3]  }
  0x11   :  { %99 = dma.done.wait [#allocation3], 256  }
  0x12   :  { %100 = vsyncadd [#allocation3], 4294967040  ;;  %v21_v0 = vld [vmem:[#allocation2] sm:$0xff]  ;;  %v22_v1 = vld [vmem:[#allocation2 + $0x8] sm:$0xff]  ;;  %s104_s18 = smov [#allocation5]  }
  0x13   :  { %v23_v2 = vmul.f32 255.0, %v21_v0  ;;  %v24_v3 = vmul.f32 255.0, %v22_v1  ;;  %s42_s19 = sshll.u32 %s104_s18, 4  ;;  %s43_s19 = int_to_ptr.vmem [resolvable:$true] %s42_s19 }
  0x14   :  { %s77_s0 = scalar_lea.vmem %s43_s19, 256  ;;  %p82_p9 = scmp.lt.s32.totalorder %s43_s19, %s43_s19 }
  0x15   :  { %v51_v4 = vround.rtne.f32 %v23_v2  ;;  %v52_v5 = vround.rtne.f32 %v24_v3  ;;  %p78_p8 = scmp.ne.s32.totalorder %s43_s19, %s77_s0  ;;  %p83_p10 = scmp.lt.s32.totalorder %s77_s0, %s77_s0 }
  0x17   :  { %v27_v6 = vmax.f32 %v51_v4, 0.0  ;;  %v28_v7 = vmax.f32 %v52_v5, 0.0  ;;  %p84_p11 = por %p83_p10, %p82_p9 }
  0x19   :  { %v29_v8 = vmin.f32 %v27_v6, 255.0  ;;  %v30_v9 = vmin.f32 %v28_v7, 255.0  ;;  %p85_p12 = pnand %p84_p11, %p78_p8 }
  0x1b   :  { %v32_v10 = vmul.f32 0.003921569, %v29_v8  ;;  %v33_v11 = vmul.f32 0.003921569, %v30_v9 }
  0x1d   :  { %34 = vst [vmem:[#allocation5] sm:$0xff] %v32_v10  ;;  %35 = vst [vmem:[#allocation5 + $0x8] sm:$0xff] %v33_v11 }
  0x1e   :  { %88 = shalt.err (!%p85_p12)
}
  0x1f   :  { %s89_s22 = scalar_lea.hbm %s140_s1, 256 }
  0x20   :  { %p90_p13 = scmp.ne.s32.totalorder %s140_s1, %s89_s22  ;;  %p93_p0 = scmp.lt.u32.totalorder %s89_s22, %s140_s1 }
  0x22   :  { %p95_p1 = pnand %p93_p0, %p90_p13 }
  0x24   :  { %98 = shalt.err (!%p95_p1)
}
  0x25   :  { %45 = dma.vmem_to_hbm [thread:$0]  %s43_s19, 256, %s140_s1, [#allocation4]  }
  0x26   :  { %101 = dma.done.wait [#allocation4], 256  }
  0x27   :  { %102 = vsyncadd [#allocation4], 4294967040 }
  0x28   :  { %49 = vsyncpa [#allocation3], 1 }
  0x29   :  { %50 = vsyncpa [#allocation4], 1 }

</bundles_post_ra>
